<compile_context>
chip_gen: v7x
topology: tpu7x:2x2x1
jax: 0.10.0
libtpu: 0.0.40
codegen_flags: <defaults>
</compile_context>

<pallas_src>
import math

import jax
import jax.numpy as jnp
from jax.experimental import pallas as pl
from jax.experimental.pallas import tpu as pltpu

TRANSE_EMB_DIM = 32


def _round_up(x, m):
    return ((x + m - 1) // m) * m


def _transe_dist_kernel(idx_ref, ent_ref, rel_ref, dist_ref):
    """Per batch tile.

    idx_ref : (3, TB) int32   -- row 0: head ids, row 1: relation ids, row 2: tail ids
    ent_ref : (D, n_ents) f32 -- transposed entity table (VMEM resident)
    rel_ref : (D, n_rels) f32 -- transposed relation table (VMEM resident)
    dist_ref: (1, TB) f32     -- L2 distance per batch column (lane-dense)
    """
    tb = dist_ref.shape[1]

    def gather_cols(table_ref, row):
        # Fused embedding gather as a one-hot MXU matmul:
        #   (D, n) @ (n, TB) -> (D, TB), selecting column idx[row, j] for lane j.
        n = table_ref.shape[1]
        ids = idx_ref[row:row + 1, :]                                 # (1, TB) int32
        onehot = (jax.lax.broadcasted_iota(jnp.int32, (n, tb), 0) == ids
                  ).astype(jnp.float32)                               # (n, TB)
        return jnp.dot(table_ref[...], onehot,
                       preferred_element_type=jnp.float32,
                       precision=jax.lax.Precision.HIGHEST)           # exact selection

    h = gather_cols(ent_ref, 0)          # (D, TB)
    r = gather_cols(rel_ref, 1)          # (D, TB)
    t = gather_cols(ent_ref, 2)          # (D, TB)

    d = h + r - t                        # full 128-lane VPU work
    # L2 norm over the embedding dim (sublane reduce -> XLU, sqrt -> EUP).
    dist_ref[...] = jnp.sqrt(jnp.sum(d * d, axis=0, keepdims=True))


def transe_forward(ent_embs, rel_embs, pos_triples, neg_triples, *, tile_b=512):
    """ent_embs: (n_ents, D) f32, rel_embs: (n_rels, D) f32, triples: (B, 3) int."""
    B = pos_triples.shape[0]
    n_ents, D = ent_embs.shape
    n_rels = rel_embs.shape[0]

    total = 2 * B
    tb = min(tile_b, _round_up(total, 128))       # lane-aligned batch tile
    padded = _round_up(total, tb)
    n_tiles = padded // tb

    # Fold pos/neg into one 2B batch; indices as (3, 2B): head / rel / tail rows.
    triples = jnp.concatenate([pos_triples, neg_triples], axis=0).astype(jnp.int32)
    idx = jnp.transpose(triples)                                   # (3, 2B)
    idx = jnp.pad(idx, ((0, 0), (0, padded - total)))              # pad with id 0 (sliced off)

    # Transposed tables: D on sublanes, entity/relation id on lanes (wrapper-side
    # layout plumbing only).
    ent_t = jnp.transpose(ent_embs).astype(jnp.float32)            # (D, n_ents)
    rel_t = jnp.transpose(rel_embs).astype(jnp.float32)            # (D, n_rels)

    cost = pl.CostEstimate(
        flops=int(2 * D * (2 * n_ents + n_rels) * padded + 5 * D * padded),
        transcendentals=int(padded),
        bytes_accessed=int(4 * (3 * padded + (n_ents + n_rels) * D + padded)),
    )

    dist = pl.pallas_call(
        _transe_dist_kernel,
        out_shape=jax.ShapeDtypeStruct((1, padded), jnp.float32),
        grid=(n_tiles,),
        in_specs=[
            pl.BlockSpec((3, tb), lambda i: (0, i)),       # per-tile triple indices
            pl.BlockSpec((D, n_ents), lambda i: (0, 0)),   # whole entity table, resident
            pl.BlockSpec((D, n_rels), lambda i: (0, 0)),   # whole relation table, resident
        ],
        out_specs=pl.BlockSpec((1, tb), lambda i: (0, i)),  # lane-dense output slab
        compiler_params=pltpu.CompilerParams(
            dimension_semantics=("parallel",),
        ),
        cost_estimate=cost,
    )(idx, ent_t, rel_t)

    dist = dist[0, :total]
    return dist[:B], dist[B:]


def xavier_uniform(key, shape):
    fan_in, fan_out = shape[0], shape[1]
    bound = math.sqrt(6.0 / (fan_in + fan_out))
    return jax.random.uniform(key, shape, jnp.float32, -bound, bound)


if __name__ == "__main__":
    n_ents, n_rels = 50, 10
    batch = 8

    key = jax.random.PRNGKey(0)
    k_ent, k_rel, k_p, k_n = jax.random.split(key, 4)

    # Deterministic parameter init (xavier_uniform_, as in the module's __init__).
    ent_embs = xavier_uniform(k_ent, (n_ents, TRANSE_EMB_DIM))
    rel_embs = xavier_uniform(k_rel, (n_rels, TRANSE_EMB_DIM))

    # Example triples: (head, relation, tail) integer indices.
    pos_h = jax.random.randint(jax.random.fold_in(k_p, 0), (batch,), 0, n_ents)
    pos_r = jax.random.randint(jax.random.fold_in(k_p, 1), (batch,), 0, n_rels)
    pos_t = jax.random.randint(jax.random.fold_in(k_p, 2), (batch,), 0, n_ents)
    neg_h = jax.random.randint(jax.random.fold_in(k_n, 0), (batch,), 0, n_ents)
    neg_r = jax.random.randint(jax.random.fold_in(k_n, 1), (batch,), 0, n_rels)
    neg_t = jax.random.randint(jax.random.fold_in(k_n, 2), (batch,), 0, n_ents)

    pos_triples = jnp.stack([pos_h, pos_r, pos_t], axis=1).astype(jnp.int32)
    neg_triples = jnp.stack([neg_h, neg_r, neg_t], axis=1).astype(jnp.int32)

    # Note: at this demo size (2B=16 rows) a plain-XLA gather+norm is faster than
    # any kernel launch; the kernel pays off at production batch sizes (thousands
    # of rows) where the fused gather + pipelined batch grid matter.
    pos_dist, neg_dist = jax.jit(transe_forward)(ent_embs, rel_embs,
                                                 pos_triples, neg_triples)
    jax.block_until_ready((pos_dist, neg_dist))

    # Reference check in plain JAX (independent gather + norm).
    def ref(ent, rel, trip):
        h = ent[trip[:, 0]]; r = rel[trip[:, 1]]; t = ent[trip[:, 2]]
        return jnp.linalg.norm(h + r - t, axis=1)

    ref_pos = ref(ent_embs, rel_embs, pos_triples)
    ref_neg = ref(ent_embs, rel_embs, neg_triples)
    assert pos_dist.shape == (batch,) and neg_dist.shape == (batch,)
    assert jnp.allclose(pos_dist, ref_pos, atol=1e-5, rtol=1e-5)
    assert jnp.allclose(neg_dist, ref_neg, atol=1e-5, rtol=1e-5)

    print("KERNEL_OK")
</pallas_src>

<mosaic_0001>
module attributes {stable_mosaic.version = 11 : i64} {
  func.func @_transe_dist_kernel(%arg0: i32, %arg1: memref<3x128xi32, #tpu.memory_space<vmem>>, %arg2: memref<32x50xf32, #tpu.memory_space<vmem>>, %arg3: memref<32x10xf32, #tpu.memory_space<vmem>>, %arg4: memref<1x128xf32, #tpu.memory_space<vmem>>) attributes {dimension_semantics = [#tpu.dimension_semantics<parallel>], iteration_bounds = array<i64: 1>, scalar_prefetch = 0 : i64, scratch_operands = 0 : i64, tpu.core_type = #tpu.core_type<tc>, window_params = [{transform_indices = @transform_0, window_bounds = array<i64: 3, 128>}, {pipeline_mode = #tpu.pipeline_mode<synchronous>, transform_indices = @transform_1, window_bounds = array<i64: 32, 50>}, {pipeline_mode = #tpu.pipeline_mode<synchronous>, transform_indices = @transform_2, window_bounds = array<i64: 32, 10>}, {transform_indices = @transform_3, window_bounds = array<i64: 1, 128>}]} {
    %c0 = arith.constant 0 : index
    %c0_0 = arith.constant 0 : index
    %0 = vector.load %arg1[%c0, %c0_0] : memref<3x128xi32, #tpu.memory_space<vmem>>, vector<1x128xi32>
    %1 = tpu.iota {dimensions = array<i32: 0>} : vector<50x128xi32>
    %2 = vector.broadcast %0 : vector<1x128xi32> to vector<50x128xi32>
    %3 = arith.cmpi eq, %1, %2 : vector<50x128xi32>
    %4 = arith.extui %3 : vector<50x128xi1> to vector<50x128xi32>
    %5 = arith.sitofp %4 : vector<50x128xi32> to vector<50x128xf32>
    %c0_1 = arith.constant 0 : index
    %c0_2 = arith.constant 0 : index
    %6 = vector.load %arg2[%c0_1, %c0_2] : memref<32x50xf32, #tpu.memory_space<vmem>>, vector<32x50xf32>
    %cst = arith.constant dense<0.000000e+00> : vector<32x128xf32>
    %7 = tpu.matmul %6, %5, %cst {dimension_numbers = #tpu.dot_dimension_numbers<[1], [0], [0], [1], [0, 0, 1, 1], [], []>, precision = #tpu.contract_precision<fp32>} : vector<32x50xf32>, vector<50x128xf32>, vector<32x128xf32> -> vector<32x128xf32>
    %c1 = arith.constant 1 : index
    %c0_3 = arith.constant 0 : index
    %8 = vector.load %arg1[%c1, %c0_3] : memref<3x128xi32, #tpu.memory_space<vmem>>, vector<1x128xi32>
    %9 = tpu.iota {dimensions = array<i32: 0>} : vector<10x128xi32>
    %10 = vector.broadcast %8 : vector<1x128xi32> to vector<10x128xi32>
    %11 = arith.cmpi eq, %9, %10 : vector<10x128xi32>
    %12 = arith.extui %11 : vector<10x128xi1> to vector<10x128xi32>
    %13 = arith.sitofp %12 : vector<10x128xi32> to vector<10x128xf32>
    %c0_4 = arith.constant 0 : index
    %c0_5 = arith.constant 0 : index
    %14 = vector.load %arg3[%c0_4, %c0_5] : memref<32x10xf32, #tpu.memory_space<vmem>>, vector<32x10xf32>
    %cst_6 = arith.constant dense<0.000000e+00> : vector<32x128xf32>
    %15 = tpu.matmul %14, %13, %cst_6 {dimension_numbers = #tpu.dot_dimension_numbers<[1], [0], [0], [1], [0, 0, 1, 1], [], []>, precision = #tpu.contract_precision<fp32>} : vector<32x10xf32>, vector<10x128xf32>, vector<32x128xf32> -> vector<32x128xf32>
    %c2 = arith.constant 2 : index
    %c0_7 = arith.constant 0 : index
    %16 = vector.load %arg1[%c2, %c0_7] : memref<3x128xi32, #tpu.memory_space<vmem>>, vector<1x128xi32>
    %17 = tpu.iota {dimensions = array<i32: 0>} : vector<50x128xi32>
    %18 = vector.broadcast %16 : vector<1x128xi32> to vector<50x128xi32>
    %19 = arith.cmpi eq, %17, %18 : vector<50x128xi32>
    %20 = arith.extui %19 : vector<50x128xi1> to vector<50x128xi32>
    %21 = arith.sitofp %20 : vector<50x128xi32> to vector<50x128xf32>
    %c0_8 = arith.constant 0 : index
    %c0_9 = arith.constant 0 : index
    %22 = vector.load %arg2[%c0_8, %c0_9] : memref<32x50xf32, #tpu.memory_space<vmem>>, vector<32x50xf32>
    %cst_10 = arith.constant dense<0.000000e+00> : vector<32x128xf32>
    %23 = tpu.matmul %22, %21, %cst_10 {dimension_numbers = #tpu.dot_dimension_numbers<[1], [0], [0], [1], [0, 0, 1, 1], [], []>, precision = #tpu.contract_precision<fp32>} : vector<32x50xf32>, vector<50x128xf32>, vector<32x128xf32> -> vector<32x128xf32>
    %24 = arith.addf %7, %15 : vector<32x128xf32>
    %25 = arith.subf %24, %23 : vector<32x128xf32>
    %26 = arith.mulf %25, %25 : vector<32x128xf32>
    %cst_11 = arith.constant dense<0.000000e+00> : vector<128xf32>
    %27 = vector.multi_reduction <add>, %26, %cst_11 [0] : vector<32x128xf32> to vector<128xf32>
    %28 = vector.shape_cast %27 : vector<128xf32> to vector<1x128xf32>
    %29 = math.sqrt %28 : vector<1x128xf32>
    %c0_12 = arith.constant 0 : index
    %c0_13 = arith.constant 0 : index
    %30 = vector.load %arg4[%c0_12, %c0_13] : memref<1x128xf32, #tpu.memory_space<vmem>>, vector<1x128xf32>
    tpu.vector_store %arg4[%c0_12, %c0_13], %29 {strides = array<i32>} : memref<1x128xf32, #tpu.memory_space<vmem>>, vector<1x128xf32>,
    return
  }
  func.func @transform_0(%arg0: i32) -> (i32, i32) {
    %c0_i32 = arith.constant 0 : i32
    %c0_i32_0 = arith.constant 0 : i32
    return %c0_i32, %arg0 : i32, i32
  }
  func.func @transform_1(%arg0: i32) -> (i32, i32) {
    %c0_i32 = arith.constant 0 : i32
    %c0_i32_0 = arith.constant 0 : i32
    %c0_i32_1 = arith.constant 0 : i32
    return %c0_i32, %c0_i32_0 : i32, i32
  }
  func.func @transform_2(%arg0: i32) -> (i32, i32) {
    %c0_i32 = arith.constant 0 : i32
    %c0_i32_0 = arith.constant 0 : i32
    %c0_i32_1 = arith.constant 0 : i32
    return %c0_i32, %c0_i32_0 : i32, i32
  }
  func.func @transform_3(%arg0: i32) -> (i32, i32) {
    %c0_i32 = arith.constant 0 : i32
    %c0_i32_0 = arith.constant 0 : i32
    return %c0_i32, %arg0 : i32, i32
  }
}

</mosaic_0001>

<bundles_post_ra>
// kernel: transe_forward.1
= control target key start
LH: loop header
LB: loop body
LE: loop exit
PB: predicated region body
PF: predicated region fallthrough
CT: control target
= control target key end

     0   :  { %v15_v0 = vlaneseq  ;;  %vm67_vm0 = vcmask 80896   ;;  %vm80_vm1 = vcmask 1041408   ;;  %v2830_v10 = vmov 0.0   ;;  %s3531_s0 = inlined_call_operand.vmem [shape: s32[3,128], index: 0, kind: input, shape index: {}]   ;;  %s3532_s2 = inlined_call_operand.vmem [shape: f32[32,10], index: 2, kind: input, shape index: {}]   ;;  %s3533_s1 = inlined_call_operand.vmem [shape: f32[32,50], index: 1, kind: input, shape index: {}]   ;;  %s3534_s3 = inlined_call_operand.vmem [shape: f32[1,128], index: 3, kind: output, shape index: {}]  }
   0x1   :  { %v2060_v1 = vld [vmem:[%s3531_s0 + $0x1] ss:$0 sm:$0xff]  ;;  %v2859_v2 = vld [vmem:[%s3531_s0 + $0x2] ss:$0 sm:$0xff]  ;;  %v64_v5 = vld [vmem:[%s3532_s2 + $0x8] sm:$0xff]  ;;  %vm698_vm7 = vcmask 408576  }
   0x2   :  { %v2861_v3 = vshrl.u32 %v15_v0, 7  ;;  %v63_v4 = vld [vmem:[%s3532_s2] sm:$0xff]  ;;  %v72_v7 = vsel %vm67_vm0, %v64_v5, 0  ;;  %v2831_v20 = vmov 1.0   ;;  %v65_v28 = vld [vmem:[%s3532_s2 + $0x10] sm:$0xff]  ;;  %v66_v33 = vld [vmem:[%s3532_s2 + $0x18] sm:$0xff] }
   0x3   :  { %v69_v6 = vsel %vm67_vm0, %v63_v4, 0  ;;  %v2883_v12 = vand.u32 4294901760, %v72_v7  ;;  %v3541_v39 = vmov 1.0|1.0   ;;  %v75_v42 = vsel %vm67_vm0, %v65_v28, 0  ;;  %v48_v50 = vld [vmem:[%s3533_s1] sm:$0xff] }
   0x4   :  { %v2872_v8 = vadd.s32 8, %v2861_v3  ;;  %vm57_vm2 = vcmp.eq.s32.totalorder %v2861_v3, %v2060_v1  ;;  %v2875_v9 = vand.u32 4294901760, %v69_v6  ;;  %vm677_vm3 = vcmp.eq.s32.totalorder %v2861_v3, %v2859_v2  ;;  %v49_v5 = vld [vmem:[%s3533_s1 + $0x8] sm:$0xff] }
   0x5   :  { %v2070_v11 = vsel %vm677_vm3, 1.0, %v2830_v10  ;;  %v2886_v13 = vadd.s32 16, %v2861_v3  ;;  %v2889_v14 = vadd.s32 24, %v2861_v3  ;;  %vm2902_vm6 = vmpackc.low %vm80_vm1, %vm57_vm2  ;;  %v2908_v19 = vsub.f32 %v72_v7, %v2883_v12 }
   0x6   :  { %vm58_vm4 = vcmp.eq.s32.totalorder %v2872_v8, %v2060_v1  ;;  %v2893_v15 = vsub.f32 %v69_v6, %v2875_v9  ;;  %vm678_vm5 = vcmp.eq.s32.totalorder %v2872_v8, %v2859_v2  ;;  %2301 = vmatprep.mubr.f32.mxu0 %v2875_v9  ;;  %v2913_v23 = vsub.f32 %v2070_v11, %v2070_v11 }
   0x7   :  { %v2062_v16 = vsel %vm58_vm4, 1.0, %v2830_v10  ;;  %v2071_v18 = vsel %vm678_vm5, 1.0, %v2830_v10  ;;  %vm679_vm8 = vcmp.eq.s32.totalorder %v2886_v13, %v2859_v2  ;;  %vm2920_vm9 = vmpackc.low %vm678_vm5, %vm677_vm3  ;;  %v163_v25 = vand.u32 4294901760, %v2908_v19 }
   0x8   :  { %v2910_v21 = vpack.c.bf16 %v2062_v16, %v2831_v20  ;;  %v153_v22 = vand.u32 4294901760, %v2893_v15  ;;  %vm680_vm10 = vcmp.eq.s32.totalorder %v2889_v14, %v2859_v2  ;;  %v2072_v26 = vsel %vm679_vm8, 1.0, %v2830_v10 }
   0x9   :  { %v2061_v27 = vsel %vm57_vm2, 1.0, %v2830_v10  ;;  %v2943_v30 = vsub.f32 %v2071_v18, %v2071_v18  ;;  %v2073_v31 = vsel %vm680_vm10, 1.0, %v2830_v10  ;;  %v82_v32 = vsel %vm80_vm1, %v2062_v16, 0  ;;  %vm2984_vm11 = vmpackc.low %vm680_vm10, %vm679_vm8 }
   0xa   :  { %2589 = vmatprep.subr.msk.bf16.mxu1 %vm2902_vm6, %v2910_v21  ;;  %v154_v29 = vsub.f32 %v2893_v15, %v153_v22  ;;  %v164_v34 = vsub.f32 %v2908_v19, %v163_v25  ;;  %v2959_v35 = vsub.f32 %v2061_v27, %v2061_v27  ;;  %v2961_v36 = vsub.f32 %v82_v32, %v82_v32 }
   0xb   :  { %2592 = vmatpush3.bf16.msk.msra.mxu1 %vm2902_vm6, %v2910_v21  ;;  %v2964_v37 = vadd.s32 32, %v2861_v3  ;;  %v2969_v40 = vsub.f32 %v2072_v26, %v2072_v26  ;;  %v2972_v41 = vadd.s32 40, %v2861_v3  ;;  %v78_v46 = vsel %vm67_vm0, %v66_v33, 0 }
   0xc   :  { %v155_v38 = vand.u32 4294901760, %v154_v29  ;;  %2618 = vmatprep.subr.msk.bf16.mxu1 %vm2920_vm9, %v3541_v39  ;;  %v165_v43 = vand.u32 4294901760, %v164_v34  ;;  %v194_v44 = vand.u32 4294901760, %v2959_v35  ;;  %v201_v45 = vand.u32 4294901760, %v2961_v36 }
   0xd   :  { %v2988_v48 = vsub.f32 %v2073_v31, %v2073_v31  ;;  %vm681_vm12 = vcmp.eq.s32.totalorder %v2964_v37, %v2859_v2  ;;  %vm682_vm13 = vcmp.eq.s32.totalorder %v2972_v41, %v2859_v2  ;;  %v2994_v49 = vand.u32 4294901760, %v75_v42 }
   0xe   :  { %2291 = vmatprep.mubr.f32.mxu1 %v155_v38  ;;  %v195_v51 = vsub.f32 %v2959_v35, %v194_v44  ;;  %v202_v52 = vsub.f32 %v2961_v36, %v201_v45  ;;  %v2074_v53 = vsel %vm681_vm12, 1.0, %v2830_v10  ;;  %v2597_v54 = vpack.c.bf16 %v2961_v36, %v2959_v35  ;;  %vm3037_vm14 = vmpackc.low %vm682_vm13, %vm681_vm12 }
   0xf   :  { %2292 = vmatmul.mubr.f32.vlgmr.msra.gmra.mrb[0].mxu1 %v165_v43  ;;  %v2075_v55 = vsel %vm682_vm13, 1.0, %v2830_v10  ;;  %v3019_v56 = vsub.f32 %v75_v42, %v2994_v49  ;;  %v3021_v57 = vand.u32 4294901760, %v78_v46  ;;  %v3024_v58 = vadd.s32 48, %v2861_v3 }
  0x10   :  { %2620 = vmatpush3.bf16.msk.msra.mxu1 %vm2920_vm9, %v3541_v39  ;;  %v196_v59 = vand.u32 4294901760, %v195_v51  ;;  %v203_v60 = vand.u32 4294901760, %v202_v52  ;;  %v700_v61 = vsel %vm698_vm7, %v48_v50, 0  ;;  %v3540_v62 = vand.u32 4294901760, %v2913_v23  ;;  %v50_v51 = vld [vmem:[%s3533_s1 + $0x10] sm:$0xff] }
  0x11   :  { %2622 = vmatprep.subr.msk.bf16.mxu1 %vm2984_vm11, %v3541_v39  ;;  %v3041_v0 = vsub.f32 %v2074_v53, %v2074_v53  ;;  %v173_v1 = vand.u32 4294901760, %v3019_v56  ;;  %v3045_v4 = vsub.f32 %v78_v46, %v3021_v57  ;;  %vm683_vm15 = vcmp.eq.s32.totalorder %v3024_v58, %v2859_v2 }
  0x12   :  { %v2593_v6 = vpack.c.bf16 %v203_v60, %v196_v59  ;;  %v3052_v7 = vsub.f32 %v2075_v55, %v2075_v55  ;;  %v3055_v11 = vsel %vm683_vm15, 1.0, %v2830_v10  ;;  %v3057_v16 = vand.u32 4294901760, %v700_v61 }
  0x13   :  { %v174_v2 = vsub.f32 %v3019_v56, %v173_v1  ;;  %v3543_v18 = vand.u32 4294901760, %v3045_v4  ;;  %v830_v20 = vsub.f32 %v2913_v23, %v3540_v62  ;;  %v3539_v26 = vand.u32 4294901760, %v2943_v30 }
  0x14   :  { %2624 = vmatpush3.bf16.msk.msra.mxu1 %vm2984_vm11, %v3541_v39  ;;  %2594 = vmatprep.subr.bf16.mxu0 %v2593_v6  ;;  %v3074_v27 = vsub.f32 %v700_v61, %v3057_v16  ;;  %v703_v28 = vsel %vm698_vm7, %v49_v5, 0  ;;  %v3538_v29 = vand.u32 4294901760, %v2969_v40  ;;  %v3537_v31 = vand.u32 4294901760, %v2988_v48 }
  0x15   :  { %2626 = vmatprep.subr.msk.bf16.mxu1 %vm3037_vm14, %v3541_v39  ;;  %2596 = vmatpush3.bf16.msra.mxu0 %v2593_v6  ;;  %v175_v32 = vand.u32 4294901760, %v174_v2  ;;  %v184_v33 = vsub.f32 %v3045_v4, %v3543_v18  ;;  %v831_v34 = vand.u32 4294901760, %v830_v20  ;;  %v837_v38 = vsub.f32 %v2943_v30, %v3539_v26  ;;  %v51_v2 = vld [vmem:[%s3533_s1 + $0x18] sm:$0xff] }
  0x16   :  { %2598 = vmatprep.subr.bf16.mxu0 %v2597_v54  ;;  %v3086_v42 = vand.u32 4294901760, %v3074_v27  ;;  %v3088_v43 = vand.u32 4294901760, %v703_v28  ;;  %v844_v46 = vsub.f32 %v2969_v40, %v3538_v29  ;;  %v851_v50 = vsub.f32 %v2988_v48, %v3537_v31 }
  0x17   :  { %2294 = vmatprep.mubr.f32.mxu1 %v175_v32  ;;  %v185_v52 = vand.u32 4294901760, %v184_v33  ;;  %v838_v53 = vand.u32 4294901760, %v837_v38  ;;  %v3536_v55 = vand.u32 4294901760, %v3041_v0  ;;  %v3535_v59 = vand.u32 4294901760, %v3052_v7 }
  0x18   :  { %2628 = vmatpush3.bf16.msk.msra.mxu1 %vm3037_vm14, %v3541_v39  ;;  %2302 = vmatmul.mubr.f32.vlgmr.msra.gmra.mrb[0].mxu0 %v2883_v12  ;;  %v789_v60 = vsub.f32 %v3074_v27, %v3086_v42  ;;  %v3110_v61 = vsub.f32 %v703_v28, %v3088_v43  ;;  %v845_v5 = vand.u32 4294901760, %v844_v46  ;;  %v852_v6 = vand.u32 4294901760, %v851_v50 }
  0x19   :  { %2359 = vmatprep.subr.msk.mxu1 %vm80_vm1, %v3055_v11  ;;  %2600 = vmatpush3.bf16.msra.mxu0 %v2597_v54  ;;  %v2629_v20 = vpack.c.bf16 %v838_v53, %v831_v34  ;;  %v858_v32 = vsub.f32 %v3041_v0, %v3536_v55  ;;  %v865_v33 = vsub.f32 %v3052_v7, %v3535_v59  ;;  %v706_v28 = vsel %vm698_vm7, %v50_v51, 0 }
  0x1a   :  { %2295 = vmatmul.mubr.f32.gmra.mrb[2].mxu1 %v185_v52  ;;  %2304 = vmatprep.mubr.f32.mxu0 %v2994_v49  ;;  %v3123_v38 = vand.u32 4294901760, %v789_v60  ;;  %v3126_v46 = vand.u32 4294901760, %v3110_v61  ;;  %v3131_v54 = vand.u32 4294901760, %v706_v28  ;;  %v709_v51 = vsel %vm698_vm7, %v51_v2, 0  ;;  %v3139_v52 = vld [vmem:[%s3531_s0] ss:$0 sm:$0xff] }
  0x1b   :  { %2603 = vmatprep.subr.msk.bf16.mxu0 %vm2902_vm6, %v2910_v21  ;;  %v859_v34 = vand.u32 4294901760, %v858_v32  ;;  %v866_v50 = vand.u32 4294901760, %v865_v33  ;;  %v3148_v59 = vand.u32 4294901760, %v709_v51  ;;  %v712_v2 = vsel %vm80_vm1, %v3055_v11, 0 }
  0x1c   :  { %2360 = vmatpush3.msk.msra.mxu1 %vm80_vm1, %v3055_v11  ;;  %2305 = vmatmul.mubr.f32.gmra.mrb[2].mxu0 %v3021_v57  ;;  %v799_v53 = vsub.f32 %v3110_v61, %v3126_v46  ;;  %v3146_v60 = vsub.f32 %v706_v28, %v3131_v54  ;;  %v2633_v32 = vpack.c.bf16 %v852_v6, %v845_v5 }
  0x1d   :  { %2361 = vmatprep.mubr.f32.mxu1 %v3123_v38  ;;  %2630 = vmatprep.subr.bf16.mxu1 %v2629_v20  ;;  %v3153_v33 = vsub.f32 %v712_v2, %v712_v2  ;;  %v2607_v28 = vpack.c.bf16 %v201_v45, %v194_v44  ;;  %v3165_v29 = vsub.f32 %v709_v51, %v3148_v59 }
  0x1e   :  { %2311 = vmatprep.mubr.f32.mxu0 %v2893_v15  ;;  %v3155_v55 = vand.u32 4294901760, %v799_v53  ;;  %v3158_v31 = vand.u32 4294901760, %v3146_v60  ;;  %v2637_v26 = vpack.c.bf16 %v866_v50, %v859_v34  ;;  %vm27_vm0 = vcmp.eq.s32.totalorder %v2861_v3, %v3139_v52 }
  0x1f   :  { %v3168_v62 = vand.u32 4294901760, %v3153_v33  ;;  %vm28_vm2 = vcmp.eq.s32.totalorder %v2872_v8, %v3139_v52  ;;  %v3179_v36 = vand.u32 4294901760, %v3165_v29  ;;  %v2053_v44 = vsel %vm27_vm0, 1.0, %v2830_v10 }
  0x20   :  { %2362 = vmatmul.mubr.f32.vlgmr.msra.gmra.mrb[4].mxu1 %v3155_v55  ;;  %2312 = vmatmul.mubr.f32.vlgmr.msra.gmra.mrb[0].mxu0 %v2908_v19  ;;  %v809_v35 = vsub.f32 %v3146_v60, %v3158_v31  ;;  %v2054_v45 = vsel %vm28_vm2, 1.0, %v2830_v10  ;;  %v3194_v6 = vsub.f32 %v2053_v44, %v2053_v44  ;;  %vm29_vm3 = vcmp.eq.s32.totalorder %v2886_v13, %v3139_v52 }
  0x21   :  { %2632 = vmatpush3.bf16.msra.mxu1 %v2629_v20  ;;  %2606 = vmatpush3.bf16.msk.msra.mxu0 %vm2902_vm6, %v2910_v21  ;;  %v872_v5 = vsub.f32 %v3153_v33, %v3168_v62  ;;  %v3196_v34 = vsub.f32 %v2054_v45, %v2054_v45  ;;  %v819_v51 = vsub.f32 %v3165_v29, %v3179_v36  ;;  %v2055_v2 = vsel %vm29_vm3, 1.0, %v2830_v10 }
  0x22   :  { %2634 = vmatprep.subr.bf16.mxu1 %v2633_v32  ;;  %2314 = vmatprep.mubr.f32.mxu0 %v3019_v56  ;;  %v3199_v50 = vand.u32 4294901760, %v809_v35  ;;  %vm30_vm4 = vcmp.eq.s32.totalorder %v2889_v14, %v3139_v52  ;;  %v1485_v20 = vand.u32 4294901760, %v3194_v6  ;;  %v3226_v39 = vsub.f32 %v2055_v2, %v2055_v2 }
  0x23   :  { %2608 = vmatprep.subr.bf16.mxu0 %v2607_v28  ;;  %v1492_v53 = vand.u32 4294901760, %v3196_v34  ;;  %v3215_v35 = vand.u32 4294901760, %v819_v51  ;;  %v2056_v44 = vsel %vm30_vm4, 1.0, %v2830_v10  ;;  %vm31_vm5 = vcmp.eq.s32.totalorder %v2964_v37, %v3139_v52  ;;  %vm3385_vm10 = vmpackc.low %vm30_vm4, %vm29_vm3 }
  0x24   :  { %2315 = vmatmul.mubr.f32.gmra.mrb[2].mxu0 %v3045_v4  ;;  %2364 = vmatprep.mubr.f32.mxu1 %v3199_v50  ;;  %v1486_v45 = vsub.f32 %v3194_v6, %v1485_v20  ;;  %v873_v51 = vand.u32 4294901760, %v872_v5  ;;  %v3234_v18 = vsub.f32 %v2056_v44, %v2056_v44  ;;  %vm32_vm7 = vcmp.eq.s32.totalorder %v2972_v41, %v3139_v52 }
  0x25   :  { %2636 = vmatpush3.bf16.msra.mxu1 %v2633_v32  ;;  %2321 = vmatprep.mubr.f32.mxu0 %v153_v22  ;;  %v1493_v32 = vsub.f32 %v3196_v34, %v1492_v53  ;;  %v2057_v15 = vsel %vm31_vm5, 1.0, %v2830_v10  ;;  %v2058_v22 = vsel %vm32_vm7, 1.0, %v2830_v10  ;;  %vm33_vm8 = vcmp.eq.s32.totalorder %v3024_v58, %v3139_v52  ;;  %vm3411_vm12 = vmpackc.low %vm32_vm7, %vm31_vm5 }
  0x26   :  { %2638 = vmatprep.subr.bf16.mxu1 %v2637_v26  ;;  %2365 = vmatmul.mubr.f32.gmra.mrb[6].mxu1 %v3215_v35  ;;  %v2641_v5 = vpack.c.bf16 %v2943_v30, %v2913_v23  ;;  %v1487_v19 = vand.u32 4294901760, %v1486_v45  ;;  %v1499_v2 = vand.u32 4294901760, %v3226_v39  ;;  %v1506_v44 = vand.u32 4294901760, %v3234_v18 }
  0x27   :  { %2381 = vmatprep.mubr.f32.mxu1 %v3057_v16  ;;  %v3260_v58 = vsub.f32 %v2057_v15, %v2057_v15  ;;  %v2645_v56 = vpack.c.bf16 %v2988_v48, %v2969_v40  ;;  %v2649_v15 = vpack.c.bf16 %v3052_v7, %v3041_v0  ;;  %v2737_v13 = vpack.c.bf16 %v1492_v53, %v1485_v20 }
  0x28   :  { %2322 = vmatmul.mubr.f32.vlgmr.msra.gmra.mrb[0].mxu0 %v163_v25  ;;  %v1494_v25 = vand.u32 4294901760, %v1493_v32  ;;  %v1500_v32 = vsub.f32 %v3226_v39, %v1499_v2  ;;  %v2741_v14 = vpack.c.bf16 %v1506_v44, %v1499_v2 }
  0x29   :  { %2640 = vmatpush3.bf16.msra.mxu1 %v2637_v26  ;;  %2610 = vmatpush3.bf16.msra.mxu0 %v2607_v28  ;;  %v3262_v26 = vsub.f32 %v2058_v22, %v2058_v22  ;;  %v3552_v28 = vand.u32 4294901760, %v3045_v4  ;;  %v1507_v4 = vsub.f32 %v3234_v18, %v1506_v44 }
  0x2a   :  { %2379 = vmatprep.subr.mxu1 %v873_v51  ;;  %2324 = vmatprep.mubr.f32.mxu0 %v173_v1  ;;  %v3269_v1 = vsel %vm33_vm8, 1.0, %v2830_v10  ;;  %v2701_v45 = vpack.c.bf16 %v1494_v25, %v1487_v19  ;;  %v1513_v10 = vand.u32 4294901760, %v3260_v58 }
  0x2b   :  { %2613 = vmatprep.subr.msk.bf16.mxu0 %vm2902_vm6, %v2910_v21  ;;  %v1368_v22 = vsel %vm80_vm1, %v3269_v1, 0  ;;  %v1508_v19 = vand.u32 4294901760, %v1507_v4 }
  0x2c   :  { %2325 = vmatmul.mubr.f32.gmra.mrb[2].mxu0 %v3552_v28  ;;  %v1514_v25 = vsub.f32 %v3260_v58, %v1513_v10  ;;  %v3299_v17 = vsub.f32 %v1368_v22, %v1368_v22 }
  0x2d   :  { %2380 = vmatpush3.msra.mxu1 %v873_v51  ;;  %2331 = vmatprep.mubr.f32.mxu0 %v2875_v9  ;;  %v1520_v51 = vand.u32 4294901760, %v3262_v26 }
  0x2e   :  { %2642 = vmatprep.subr.bf16.mxu1 %v2641_v5  ;;  %2382 = vmatmul.mubr.f32.vlgmr.msra.gmra.mrb[4].mxu1 %v3088_v43  ;;  %v3304_v4 = vand.u32 4294901760, %v3299_v17 }
  0x2f   :  { %2644 = vmatpush3.bf16.msra.mxu1 %v2641_v5  ;;  %2384 = vmatprep.mubr.f32.mxu1 %v3131_v54  ;;  %v1501_v5 = vand.u32 4294901760, %v1500_v32  ;;  %v1521_v28 = vsub.f32 %v3262_v26, %v1520_v51  ;;  %v2745_v24 = vpack.c.bf16 %v1520_v51, %v1513_v10 }
  0x30   :  { %2646 = vmatprep.subr.bf16.mxu1 %v2645_v56  ;;  %2332 = vmatmul.mubr.f32.vlgmr.msra.gmra.mrb[0].mxu0 %v2883_v12 }
  0x31   :  { %2616 = vmatpush3.bf16.msk.msra.mxu0 %vm2902_vm6, %v2910_v21  ;;  %2334 = vmatprep.mubr.f32.mxu0 %v2994_v49  ;;  %v2705_v21 = vpack.c.bf16 %v1508_v19, %v1501_v5  ;;  %v1522_v32 = vand.u32 4294901760, %v1521_v28  ;;  %v3556_v19 = vand.u32 4294901760, %v2969_v40  ;;  %v3559_v40 = vand.u32 4294901760, %v3052_v7  ;;  %vm3373_vm6 = vmpackc.low %vm28_vm2, %vm27_vm0 }
  0x32   :  { %2385 = vmatmul.mubr.f32.gmra.mrb[6].mxu1 %v3148_v59  ;;  %2702 = vmatprep.subr.bf16.mxu0 %v2701_v45 }
  0x33   :  { %2648 = vmatpush3.bf16.msra.mxu1 %v2645_v56  ;;  %2401 = vmatprep.mubr.f32.mxu1 %v3074_v27  ;;  %v1515_v56 = vand.u32 4294901760, %v1514_v25  ;;  %v3557_v25 = vand.u32 4294901760, %v2988_v48 }
  0x34   :  { %2650 = vmatprep.subr.bf16.mxu1 %v2649_v15  ;;  %2335 = vmatmul.mubr.f32.gmra.mrb[2].mxu0 %v3021_v57 }
  0x35   :  { %2341 = vmatprep.mubr.f32.mxu0 %v2875_v9  ;;  %v2709_v22 = vpack.c.bf16 %v1522_v32, %v1515_v56  ;;  %v1528_v9 = vsub.f32 %v3299_v17, %v3304_v4  ;;  %v2669_v28 = vpack.c.bf16 %v3557_v25, %v3556_v19 }
  0x37   :  { %2652 = vmatpush3.bf16.msra.mxu1 %v2649_v15  ;;  %v3553_v15 = vmov 1.0|1.0  }
  0x38   :  { %2399 = vmatprep.subr.mxu1 %v3153_v33  ;;  %2342 = vmatmul.mubr.f32.vlgmr.msra.gmra.mrb[0].mxu0 %v2883_v12  ;;  %v1529_v12 = vand.u32 4294901760, %v1528_v9 }
  0x39   :  { %2704 = vmatpush3.bf16.msra.mxu0 %v2701_v45  ;;  %2344 = vmatprep.mubr.f32.mxu0 %v2994_v49  ;;  %v2713_v49 = vpack.c.bf16 %v3196_v34, %v3194_v6  ;;  %v3555_v45 = vand.u32 4294901760, %v2943_v30  ;;  %v3558_v30 = vand.u32 4294901760, %v3041_v0 }
  0x3a   :  { %2706 = vmatprep.subr.bf16.mxu0 %v2705_v21 }
  0x3b   :  { %2400 = vmatpush3.msra.mxu1 %v3153_v33  ;;  %v3554_v33 = vand.u32 4294901760, %v2913_v23  ;;  %v2721_v23 = vpack.c.bf16 %v3262_v26, %v3260_v58  ;;  %v2673_v48 = vpack.c.bf16 %v3559_v40, %v3558_v30 }
  0x3c   :  { %2654 = vmatprep.subr.msk.bf16.mxu1 %vm2920_vm9, %v3553_v15  ;;  %2402 = vmatmul.mubr.f32.vlgmr.msra.gmra.mrb[4].mxu1 %v3110_v61 }
  0x3d   :  { %2656 = vmatpush3.bf16.msk.msra.mxu1 %vm2920_vm9, %v3553_v15  ;;  %2345 = vmatmul.mubr.f32.gmra.mrb[2].mxu0 %v3021_v57  ;;  %v2717_v57 = vpack.c.bf16 %v3234_v18, %v3226_v39  ;;  %v2665_v5 = vpack.c.bf16 %v3555_v45, %v3554_v33 }
  0x3e   :  { %2708 = vmatpush3.bf16.msra.mxu0 %v2705_v21  ;;  %2658 = vmatprep.subr.msk.bf16.mxu1 %vm2984_vm11, %v3553_v15 }
  0x3f   :  { %2710 = vmatprep.subr.bf16.mxu0 %v2709_v22  ;;  %2404 = vmatprep.mubr.f32.mxu1 %v3146_v60 }
  0x40   :  { %2405 = vmatmul.mubr.f32.gmra.mrb[6].mxu1 %v3165_v29  ;;  %2501 = vmatprep.mubr.f32.mxu0 %v3057_v16 }
  0x41   :  { %2660 = vmatpush3.bf16.msk.msra.mxu1 %vm2984_vm11, %v3553_v15  ;;  %2421 = vmatprep.mubr.f32.mxu1 %v3086_v42 }
  0x42   :  { %2712 = vmatpush3.bf16.msra.mxu0 %v2709_v22  ;;  %2662 = vmatprep.subr.msk.bf16.mxu1 %vm3037_vm14, %v3553_v15 }
  0x43   :  { %2499 = vmatprep.subr.mxu0 %v1529_v12 }
  0x45   :  { %2664 = vmatpush3.bf16.msk.msra.mxu1 %vm3037_vm14, %v3553_v15 }
  0x46   :  { %2500 = vmatpush3.msra.mxu0 %v1529_v12  ;;  %2419 = vmatprep.subr.msk.mxu1 %vm80_vm1, %v3055_v11 }
  0x47   :  { %2714 = vmatprep.subr.bf16.mxu0 %v2713_v49  ;;  %2502 = vmatmul.mubr.f32.vlgmr.msra.gmra.mrb[4].mxu0 %v3088_v43 }
  0x48   :  { %2716 = vmatpush3.bf16.msra.mxu0 %v2713_v49  ;;  %2504 = vmatprep.mubr.f32.mxu0 %v3131_v54 }
  0x49   :  { %2420 = vmatpush3.msk.msra.mxu1 %vm80_vm1, %v3055_v11  ;;  %2718 = vmatprep.subr.bf16.mxu0 %v2717_v57 }
  0x4a   :  { %2666 = vmatprep.subr.bf16.mxu1 %v2665_v5  ;;  %2422 = vmatmul.mubr.f32.vlgmr.msra.gmra.mrb[4].mxu1 %v3126_v46 }
  0x4b   :  { %2668 = vmatpush3.bf16.msra.mxu1 %v2665_v5  ;;  %2505 = vmatmul.mubr.f32.gmra.mrb[6].mxu0 %v3148_v59 }
  0x4c   :  { %2720 = vmatpush3.bf16.msra.mxu0 %v2717_v57  ;;  %2670 = vmatprep.subr.bf16.mxu1 %v2669_v28 }
  0x4d   :  { %2722 = vmatprep.subr.bf16.mxu0 %v2721_v23  ;;  %2424 = vmatprep.mubr.f32.mxu1 %v3158_v31 }
  0x4e   :  { %2425 = vmatmul.mubr.f32.gmra.mrb[6].mxu1 %v3179_v36  ;;  %2521 = vmatprep.mubr.f32.mxu0 %v3074_v27 }
  0x4f   :  { %2672 = vmatpush3.bf16.msra.mxu1 %v2669_v28  ;;  %2441 = vmatprep.mubr.f32.mxu1 %v3057_v16 }
  0x50   :  { %2724 = vmatpush3.bf16.msra.mxu0 %v2721_v23  ;;  %2674 = vmatprep.subr.bf16.mxu1 %v2673_v48 }
  0x51   :  { %2519 = vmatprep.subr.mxu0 %v3299_v17 }
  0x53   :  { %2676 = vmatpush3.bf16.msra.mxu1 %v2673_v48 }
  0x54   :  { %2520 = vmatpush3.msra.mxu0 %v3299_v17  ;;  %2439 = vmatprep.subr.mxu1 %v3168_v62 }
  0x55   :  { %2726 = vmatprep.subr.msk.bf16.mxu0 %vm3373_vm6, %v3553_v15  ;;  %2522 = vmatmul.mubr.f32.vlgmr.msra.gmra.mrb[4].mxu0 %v3110_v61 }
  0x56   :  { %2728 = vmatpush3.bf16.msk.msra.mxu0 %vm3373_vm6, %v3553_v15  ;;  %2524 = vmatprep.mubr.f32.mxu0 %v3146_v60 }
  0x57   :  { %2440 = vmatpush3.msra.mxu1 %v3168_v62  ;;  %2730 = vmatprep.subr.msk.bf16.mxu0 %vm3385_vm10, %v3553_v15 }
  0x58   :  { %2678 = vmatprep.subr.msk.bf16.mxu1 %vm2920_vm9, %v3553_v15  ;;  %2442 = vmatmul.mubr.f32.vlgmr.msra.gmra.mrb[4].mxu1 %v3088_v43 }
  0x59   :  { %2680 = vmatpush3.bf16.msk.msra.mxu1 %vm2920_vm9, %v3553_v15  ;;  %2444 = vmatprep.mubr.f32.mxu1 %v3131_v54 }
  0x5a   :  { %2732 = vmatpush3.bf16.msk.msra.mxu0 %vm3385_vm10, %v3553_v15  ;;  %2682 = vmatprep.subr.msk.bf16.mxu1 %vm2984_vm11, %v3553_v15 }
  0x5b   :  { %2734 = vmatprep.subr.msk.bf16.mxu0 %vm3411_vm12, %v3553_v15  ;;  %2525 = vmatmul.mubr.f32.gmra.mrb[6].mxu0 %v3165_v29 }
  0x5c   :  { %2445 = vmatmul.mubr.f32.gmra.mrb[6].mxu1 %v3148_v59  ;;  %2541 = vmatprep.mubr.f32.mxu0 %v3086_v42 }
  0x5d   :  { %2684 = vmatpush3.bf16.msk.msra.mxu1 %vm2984_vm11, %v3553_v15  ;;  %2461 = vmatprep.mubr.f32.mxu1 %v3057_v16 }
  0x5e   :  { %2736 = vmatpush3.bf16.msk.msra.mxu0 %vm3411_vm12, %v3553_v15  ;;  %2686 = vmatprep.subr.msk.bf16.mxu1 %vm3037_vm14, %v3553_v15 }
  0x5f   :  { %2539 = vmatprep.subr.msk.mxu0 %vm80_vm1, %v3269_v1 }
  0x61   :  { %2688 = vmatpush3.bf16.msk.msra.mxu1 %vm3037_vm14, %v3553_v15 }
  0x62   :  { %2540 = vmatpush3.msk.msra.mxu0 %vm80_vm1, %v3269_v1  ;;  %2459 = vmatprep.subr.msk.mxu1 %vm80_vm1, %v3055_v11 }
  0x63   :  { %2738 = vmatprep.subr.bf16.mxu0 %v2737_v13  ;;  %2542 = vmatmul.mubr.f32.vlgmr.msra.gmra.mrb[4].mxu0 %v3126_v46 }
  0x64   :  { %2740 = vmatpush3.bf16.msra.mxu0 %v2737_v13  ;;  %2544 = vmatprep.mubr.f32.mxu0 %v3158_v31 }
  0x65   :  { %2460 = vmatpush3.msk.msra.mxu1 %vm80_vm1, %v3055_v11  ;;  %2742 = vmatprep.subr.bf16.mxu0 %v2741_v14 }
  0x66   :  { %2462 = vmatmul.mubr.f32.vlgmr.msra.gmra.mrb[4].mxu1 %v3088_v43  ;;  %2690 = vmatprep.subr.msk.bf16.mxu1 %vm3373_vm6, %v3553_v15 }
  0x67   :  { %2692 = vmatpush3.bf16.msk.msra.mxu1 %vm3373_vm6, %v3553_v15  ;;  %2464 = vmatprep.mubr.f32.mxu1 %v3131_v54 }
  0x68   :  { %2744 = vmatpush3.bf16.msra.mxu0 %v2741_v14  ;;  %2694 = vmatprep.subr.msk.bf16.mxu1 %vm3385_vm10, %v3553_v15 }
  0x69   :  { %2746 = vmatprep.subr.bf16.mxu0 %v2745_v24  ;;  %2545 = vmatmul.mubr.f32.gmra.mrb[6].mxu0 %v3179_v36 }
  0x6a   :  { %2465 = vmatmul.mubr.f32.gmra.mrb[6].mxu1 %v3148_v59  ;;  %2561 = vmatprep.mubr.f32.mxu0 %v3057_v16 }
  0x6b   :  { %2696 = vmatpush3.bf16.msk.msra.mxu1 %vm3385_vm10, %v3553_v15  ;;  %2481 = vmatprep.mubr.f32.mxu1 %v3123_v38 }
  0x6c   :  { %2748 = vmatpush3.bf16.msra.mxu0 %v2745_v24  ;;  %2698 = vmatprep.subr.msk.bf16.mxu1 %vm3411_vm12, %v3553_v15 }
  0x6d   :  { %2559 = vmatprep.subr.mxu0 %v3304_v4 }
  0x6f   :  { %2700 = vmatpush3.bf16.msk.msra.mxu1 %vm3411_vm12, %v3553_v15 }
  0x70   :  { %2560 = vmatpush3.msra.mxu0 %v3304_v4  ;;  %2479 = vmatprep.subr.msk.mxu1 %vm80_vm1, %v3269_v1 }
  0x71   :  { %2750 = vmatprep.subr.msk.bf16.mxu0 %vm3373_vm6, %v3553_v15  ;;  %2562 = vmatmul.mubr.f32.vlgmr.msra.gmra.mrb[4].mxu0 %v3088_v43 }
  0x72   :  { %2752 = vmatpush3.bf16.msk.msra.mxu0 %vm3373_vm6, %v3553_v15  ;;  %2564 = vmatprep.mubr.f32.mxu0 %v3131_v54 }
  0x73   :  { %2480 = vmatpush3.msk.msra.mxu1 %vm80_vm1, %v3269_v1  ;;  %2754 = vmatprep.subr.msk.bf16.mxu0 %vm3385_vm10, %v3553_v15 }
  0x74   :  { %2482 = vmatmul.mubr.f32.vlgmr.msra.gmra.mrb[8].mxu1 %v3155_v55 }
  0x75   :  { %2484 = vmatprep.mubr.f32.mxu1 %v3199_v50  ;;  %2565 = vmatmul.mubr.f32.gmra.mrb[6].mxu0 %v3148_v59 }
  0x76   :  { %2756 = vmatpush3.bf16.msk.msra.mxu0 %vm3385_vm10, %v3553_v15  ;;  %2581 = vmatprep.mubr.f32.mxu0 %v3057_v16 }
  0x77   :  { %2758 = vmatprep.subr.msk.bf16.mxu0 %vm3411_vm12, %v3553_v15 }
  0x78   :  { %2485 = vmatmul.mubr.f32.gmra.mrb[10].mxu1 %v3215_v35 }
  0x7a   :  { %2760 = vmatpush3.bf16.msk.msra.mxu0 %vm3411_vm12, %v3553_v15 }
  0x7b   :  { %2579 = vmatprep.subr.msk.mxu0 %vm80_vm1, %v3269_v1 }
  0x7e   :  { %2580 = vmatpush3.msk.msra.mxu0 %vm80_vm1, %v3269_v1 }
  0x7f   :  { %2582 = vmatmul.mubr.f32.vlgmr.msra.gmra.mrb[4].mxu0 %v3088_v43 }
  0x80   :  { %2584 = vmatprep.mubr.f32.mxu0 %v3131_v54 }
  0x83   :  { %2585 = vmatmul.mubr.f32.gmra.mrb[6].mxu0 %v3148_v59 }
  0xe2   :  { %v2293_v37 = vpop.f32.mrb[0].mxu1 }
  0xe3   :  { %v157_v39 = vpop.f32.mrb[1].mxu1 }
  0xed   :  { %v2296_v41 = vpop.f32.mrb[2].mxu1 }
  0xee   :  { %v177_v47 = vpop.f32.mrb[3].mxu1 }
 0x10b   :  { %v2343_v62 = vpop.f32.mrb[0].mxu0 }
 0x10c   :  { %v2761_v63 = vadd.f32 %v2343_v62, %v2293_v37  ;;  %v650_v7 = vpop.f32.mrb[1].mxu0 }
 0x10d   :  { %v2764_v11 = vadd.f32 %v650_v7, %v157_v39 }
 0x110   :  { %v2346_v16 = vpop.f32.mrb[2].mxu0 }
 0x111   :  { %v2767_v18 = vadd.f32 %v2346_v16, %v2296_v41  ;;  %v662_v27 = vpop.f32.mrb[3].mxu0 }
 0x112   :  { %v2770_v29 = vadd.f32 %v662_v27, %v177_v47 }
 0x139   :  { %v2463_v31 = vpop.f32.mrb[4].mxu1 }
 0x13a   :  { %v1345_v42 = vpop.f32.mrb[5].mxu1 }
 0x13d   :  { %v2466_v55 = vpop.f32.mrb[6].mxu1 }
 0x13e   :  { %v1357_v43 = vpop.f32.mrb[7].mxu1 }
 0x147   :  { %v2483_v61 = vpop.f32.mrb[8].mxu1 }
 0x148   :  { %v2762_v38 = vadd.f32 %v2761_v63, %v2483_v61  ;;  %v1448_v46 = vpop.f32.mrb[9].mxu1 }
 0x149   :  { %v2765_v59 = vadd.f32 %v2764_v11, %v1448_v46 }
 0x14b   :  { %v2486_v54 = vpop.f32.mrb[10].mxu1 }
 0x14c   :  { %v2768_v52 = vadd.f32 %v2767_v18, %v2486_v54  ;;  %v1468_v60 = vpop.f32.mrb[11].mxu1 }
 0x14d   :  { %v2771_v36 = vadd.f32 %v2770_v29, %v1468_v60 }
 0x152   :  { %v2583_v6 = vpop.f32.mrb[4].mxu0 }
 0x153   :  { %v2763_v34 = vadd.f32 %v2762_v38, %v2583_v6  ;;  %v2001_v50 = vpop.f32.mrb[5].mxu0 }
 0x154   :  { %v2766_v20 = vadd.f32 %v2765_v59, %v2001_v50 }
 0x155   :  { %v2024_v53 = vsub.f32 %v2763_v34, %v2463_v31 }
 0x156   :  { %v2023_v35 = vsub.f32 %v2766_v20, %v1345_v42  ;;  %v2586_v2 = vpop.f32.mrb[6].mxu0 }
 0x157   :  { %v2028_v44 = vmul.f32 %v2024_v53, %v2024_v53  ;;  %v2769_v58 = vadd.f32 %v2768_v52, %v2586_v2  ;;  %v2013_v26 = vpop.f32.mrb[7].mxu0 }
 0x158   :  { %v2027_v1 = vmul.f32 %v2023_v35, %v2023_v35  ;;  %v2772_v10 = vadd.f32 %v2771_v36, %v2013_v26 }
 0x159   :  { %v2026_v51 = vsub.f32 %v2769_v58, %v2466_v55 }
 0x15a   :  { %v2031_v17 = vadd.f32 %v2028_v44, %v2027_v1  ;;  %v2025_v21 = vsub.f32 %v2772_v10, %v1357_v43 }
 0x15b   :  { %v2030_v32 = vmul.f32 %v2026_v51, %v2026_v51 }
 0x15c   :  { %v2029_v56 = vmul.f32 %v2025_v21, %v2025_v21 }
 0x15e   :  { %v2032_v4 = vadd.f32 %v2031_v17, %v2029_v56 }
 0x160   :  { %v2033_v22 = vadd.f32 %v2032_v4, %v2030_v32 }
 0x162   :  { %v2034_v9 = vrot.slane %v2033_v22, 4 }
 0x164   :  { %v2035_v15 = vadd.f32 %v2034_v9, %v2033_v22 }
 0x166   :  { %v2036_v12 = vrot.slane %v2035_v15, 2 }
 0x168   :  { %v2037_v49 = vadd.f32 %v2036_v12, %v2035_v15 }
 0x16a   :  { %v2038_v57 = vrot.slane %v2037_v49, 1 }
 0x16c   :  { %v2039_v33 = vadd.f32 %v2038_v57, %v2037_v49 }
 0x16e   :  { %2828 = vrsqrt.f32 %v2039_v33  ;;  %vm2042_vm1 = vcmp.eq.f32.partialorder %v2039_v33, inf  ;;  %v2045_v19 = vand.u32 2147483648, %v2039_v33  ;;  %vm2044_vm9 = vcmp.eq.f32.partialorder %v2039_v33, 0.0 }
 0x178   :  { %v2829_v45 = vpop.eup %2828 }
 0x179   :  { %v2041_v5 = vmul.f32 %v2829_v45, %v2039_v33 }
 0x17b   :  { %v2043_v25 = vsel %vm2042_vm1, %v2039_v33, %v2041_v5 }
 0x17c   :  { %v2046_v28 = vsel %vm2044_vm9, %v2045_v19, %v2043_v25 }
 0x17d   :  { %2047 = vst [vmem:[%s3534_s3] sm:$0x1] %v2046_v28 }

</bundles_post_ra>
